<compile_context>
chip_gen: v5e
topology: v5e:2x2
jax: 0.10.0
libtpu: 0.0.40
codegen_flags: <defaults>
</compile_context>

<pallas_src>
import math

import jax
import jax.numpy as jnp
from jax import lax
from jax.experimental import pallas as pl
from jax.experimental.pallas import tpu as pltpu

_TARGET_BLOCK_ELEMS = 1 << 20    # ~4 MiB f32 per input stream per grid step
_CHUNK_ELEMS = 1 << 14           # ~16 vregs per stream per inner-loop iteration
_VMEM_LIMIT_BYTES = 48 * 1024 * 1024
_MAX_COLS = 1 << 17              # degenerate-shape guard for the kernel path


def _round_down(v, m):
    return (v // m) * m


def _round_up(v, m):
    return ((v + m - 1) // m) * m


def _bce_term(x, y, binary_targets):
    """y*log(x) + (1-y)*log(1-x) with PyTorch's clamp(log, -100).

    Negation is hoisted to the wrapper."""
    if binary_targets:
        # Hard {0,1} targets: one log + one select (halves EUP pushes).
        p = jnp.where(y >= 0.5, x, 1.0 - x)
        return jnp.maximum(jnp.log(p), -100.0)
    log_x = jnp.maximum(jnp.log(x), -100.0)
    log_1mx = jnp.maximum(jnp.log(1.0 - x), -100.0)
    return log_1mx + y * (log_x - log_1mx)


def _make_bce_partial_kernel(*, rows_valid, row_blk, chunk_rows, cols,
                             need_row_mask, binary_targets):
    """Kernel over one (row_blk, cols) block; writes an (8, cols) partial sum."""
    n_chunks = row_blk // chunk_rows

    def kernel(x_ref, y_ref, out_ref):
        row0 = pl.program_id(1) * row_blk   # first absolute row of this block

        def body(i, acc):
            start = i * chunk_rows
            if not isinstance(start, int):
                start = pl.multiple_of(start, chunk_rows)
            x = x_ref[pl.ds(start, chunk_rows), :].astype(jnp.float32)
            y = y_ref[pl.ds(start, chunk_rows), :].astype(jnp.float32)
            term = _bce_term(x, y, binary_targets)
            if need_row_mask:
                # Rows past the true extent (ragged last block) contribute 0.
                limit = rows_valid - row0 - start
                ridx = lax.broadcasted_iota(jnp.int32, (chunk_rows, cols), 0)
                term = jnp.where(ridx < limit, term, 0.0)
            # Pure-VPU partial reduction into a vreg-shaped (8, cols) slab.
            return acc + term.reshape(chunk_rows // 8, 8, cols).sum(axis=0)

        acc0 = jnp.zeros((8, cols), jnp.float32)
        if n_chunks <= 8:
            acc = acc0
            for i in range(n_chunks):        # fully unrolled at trace time
                acc = body(i, acc)
        else:
            acc = lax.fori_loop(0, n_chunks, body, acc0)
        out_ref[...] = acc

    return kernel


def _bce_mean_ref(x, y):
    x = x.astype(jnp.float32)
    y = y.astype(jnp.float32)
    term = (y * jnp.maximum(jnp.log(x), -100.0)
            + (1.0 - y) * jnp.maximum(jnp.log(1.0 - x), -100.0))
    return -jnp.mean(term)


def segmentation_loss(segment, groundtruth, assume_binary_targets=False):
    """BCE(mean) between `segment` and `groundtruth` (same shape, values in [0,1]).

    Matches torch.nn.BCELoss(reduction='mean') applied to view(B, -1) inputs
    (identical to the mean over all elements).  Set assume_binary_targets=True
    only when groundtruth is a hard {0,1} mask (saves half the log work).
    """
    assert segment.shape == groundtruth.shape
    shape = segment.shape
    n_total = math.prod(shape)

    if segment.ndim < 2 or n_total == 0:
        # Degenerate rank/size: not worth a kernel launch.
        return _bce_mean_ref(segment, groundtruth)

    # Collapse leading dims (always layout-preserving): (S, R, C).
    S = math.prod(shape[:-2]) if segment.ndim > 2 else 1
    R, C = shape[-2], shape[-1]
    if S == 1 or R % 8 == 0:
        # Merging R into the row axis keeps the (8, 128)-tiled layout intact
        # when R % 8 == 0 (and trivially when S == 1): still zero-copy.
        S_prime, R_prime = 1, S * R
    else:
        S_prime, R_prime = S, R
    cols = C

    if R_prime < 8 or cols > _MAX_COLS:
        # TODO(synk): degenerate shapes (<8 rows after collapse, or an absurdly
        # wide last dim) fall back to plain JAX; the module never hits this.
        return _bce_mean_ref(segment, groundtruth)

    x3 = segment.reshape(S_prime, R_prime, cols)
    y3 = groundtruth.reshape(S_prime, R_prime, cols)

    # --- Block / chunk geometry -------------------------------------------
    chunk_rows = max(8, _round_down(_CHUNK_ELEMS // cols, 8))
    row_blk = max(8, _round_down(_TARGET_BLOCK_ELEMS // cols, 8))
    row_blk = min(row_blk, _round_down(R_prime, 8))
    chunk_rows = min(chunk_rows, row_blk)
    row_blk = _round_down(row_blk, chunk_rows)          # multiple of chunk_rows
    grid_r = -(-R_prime // row_blk)
    # v7x megacore: make sure there are >=2 independent blocks when there is
    # enough work for two TensorCores.
    if S_prime * grid_r < 2 and R_prime >= 2 * chunk_rows:
        row_blk = max(chunk_rows, _round_up(-(-R_prime // 2), chunk_rows))
        grid_r = -(-R_prime // row_blk)
    need_row_mask = (R_prime % row_blk) != 0

    kernel = _make_bce_partial_kernel(
        rows_valid=R_prime, row_blk=row_blk, chunk_rows=chunk_rows, cols=cols,
        need_row_mask=need_row_mask, binary_targets=assume_binary_targets)

    out_rows = grid_r * 8
    bytes_accessed = (n_total * (x3.dtype.itemsize + y3.dtype.itemsize)
                      + S_prime * out_rows * cols * 4)
    cost = pl.CostEstimate(
        flops=8 * n_total,
        transcendentals=(1 if assume_binary_targets else 2) * n_total,
        bytes_accessed=bytes_accessed)

    partials = pl.pallas_call(
        kernel,
        out_shape=jax.ShapeDtypeStruct((S_prime, out_rows, cols), jnp.float32),
        grid_spec=pltpu.PrefetchScalarGridSpec(
            num_scalar_prefetch=0,
            grid=(S_prime, grid_r),
            in_specs=[
                pl.BlockSpec((None, row_blk, cols), lambda s, r: (s, r, 0)),
                pl.BlockSpec((None, row_blk, cols), lambda s, r: (s, r, 0)),
            ],
            out_specs=pl.BlockSpec((None, 8, cols), lambda s, r: (s, r, 0)),
        ),
        compiler_params=pltpu.CompilerParams(
            dimension_semantics=("parallel", "parallel"),
            vmem_limit_bytes=_VMEM_LIMIT_BYTES,
        ),
        cost_estimate=cost,
    )(x3, y3)

    # Tiny epilogue: cross-block reduce, negation, mean over the TRUE count.
    return -jnp.sum(partials) / jnp.float32(n_total)


# TODO(synk): the PyTorch module's torch.isnan(...) / pdb debug hook is
# host-side debugging and is intentionally not translated into the kernel.


if __name__ == "__main__":
    loss_fn = jax.jit(segmentation_loss, static_argnames=("assume_binary_targets",))

    def make_inputs(shape, key):
        k1, k2 = jax.random.split(key)
        logits = jax.random.normal(k1, shape, dtype=jnp.float32)
        segment = jax.nn.sigmoid(logits)            # probability map in (0, 1)
        groundtruth = (jax.random.uniform(k2, shape) > 0.5).astype(jnp.float32)
        return segment, groundtruth

    # Main case: aligned shape -> zero-copy 2-D collapse, no ragged masking.
    seg_a, gt_a = make_inputs((2, 4, 16, 16), jax.random.PRNGKey(0))
    # Secondary case: rows not a multiple of 8 -> 3-D path + ragged-row masking.
    seg_b, gt_b = make_inputs((2, 4, 17, 16), jax.random.PRNGKey(1))

    ok = True
    for seg, gt in ((seg_a, gt_a), (seg_b, gt_b)):
        ref = _bce_mean_ref(seg, gt)
        for binary in (False, True):
            loss = loss_fn(seg, gt, assume_binary_targets=binary)
            loss = jax.block_until_ready(loss)
            if not jnp.allclose(loss, ref, rtol=1e-5, atol=1e-5):
                ok = False
                print("MISMATCH", seg.shape, binary, float(loss), float(ref))

    if ok:
        print("KERNEL_OK")
</pallas_src>

<mosaic_0001>
module attributes {stable_mosaic.version = 11 : i64} {
  func.func @kernel(%arg0: i32, %arg1: i32, %arg2: memref<1x128x16xf32, #tpu.memory_space<vmem>>, %arg3: memref<1x128x16xf32, #tpu.memory_space<vmem>>, %arg4: memref<1x8x16xf32, #tpu.memory_space<vmem>>) attributes {dimension_semantics = [#tpu.dimension_semantics<parallel>, #tpu.dimension_semantics<parallel>], iteration_bounds = array<i64: 1, 1>, scalar_prefetch = 0 : i64, scratch_operands = 0 : i64, tpu.core_type = #tpu.core_type<tc>, window_params = [{transform_indices = @transform_0, window_bounds = array<i64: 1, 128, 16>}, {transform_indices = @transform_1, window_bounds = array<i64: 1, 128, 16>}, {transform_indices = @transform_2, window_bounds = array<i64: 1, 8, 16>}]} {
    %cst = arith.constant 0.000000e+00 : f32
    %0 = vector.broadcast %cst : f32 to vector<8x16xf32>
    %c0 = arith.constant 0 : index
    %c0_0 = arith.constant 0 : index
    %c0_1 = arith.constant 0 : index
    %1 = vector.load %arg2[%c0, %c0_0, %c0_1] : memref<1x128x16xf32, #tpu.memory_space<vmem>>, vector<1x128x16xf32>
    %2 = vector.shape_cast %1 : vector<1x128x16xf32> to vector<128x16xf32>
    %c0_2 = arith.constant 0 : index
    %c0_3 = arith.constant 0 : index
    %c0_4 = arith.constant 0 : index
    %3 = vector.load %arg3[%c0_2, %c0_3, %c0_4] : memref<1x128x16xf32, #tpu.memory_space<vmem>>, vector<1x128x16xf32>
    %4 = vector.shape_cast %3 : vector<1x128x16xf32> to vector<128x16xf32>
    %5 = math.log %2 : vector<128x16xf32>
    %cst_5 = arith.constant -1.000000e+02 : f32
    %6 = vector.broadcast %cst_5 : f32 to vector<128x16xf32>
    %7 = arith.maximumf %5, %6 : vector<128x16xf32>
    %cst_6 = arith.constant 1.000000e+00 : f32
    %8 = vector.broadcast %cst_6 : f32 to vector<128x16xf32>
    %9 = arith.subf %8, %2 : vector<128x16xf32>
    %10 = math.log %9 : vector<128x16xf32>
    %cst_7 = arith.constant -1.000000e+02 : f32
    %11 = vector.broadcast %cst_7 : f32 to vector<128x16xf32>
    %12 = arith.maximumf %10, %11 : vector<128x16xf32>
    %13 = arith.subf %7, %12 : vector<128x16xf32>
    %14 = arith.mulf %4, %13 : vector<128x16xf32>
    %15 = arith.addf %12, %14 : vector<128x16xf32>
    %16 = vector.shape_cast %15 : vector<128x16xf32> to vector<16x8x16xf32>
    %cst_8 = arith.constant dense<0.000000e+00> : vector<8x16xf32>
    %17 = vector.multi_reduction <add>, %16, %cst_8 [0] : vector<16x8x16xf32> to vector<8x16xf32>
    %18 = arith.addf %0, %17 : vector<8x16xf32>
    %c0_9 = arith.constant 0 : index
    %c0_10 = arith.constant 0 : index
    %c0_11 = arith.constant 0 : index
    %19 = vector.load %arg4[%c0_9, %c0_10, %c0_11] : memref<1x8x16xf32, #tpu.memory_space<vmem>>, vector<1x8x16xf32>
    %20 = vector.shape_cast %19 : vector<1x8x16xf32> to vector<8x16xf32>
    %21 = vector.shape_cast %18 : vector<8x16xf32> to vector<1x8x16xf32>
    tpu.vector_store %arg4[%c0_9, %c0_10, %c0_11], %21 {strides = array<i32>} : memref<1x8x16xf32, #tpu.memory_space<vmem>>, vector<1x8x16xf32>,
    return
  }
  func.func @transform_0(%arg0: i32, %arg1: i32) -> (i32, i32, i32) {
    %c0_i32 = arith.constant 0 : i32
    %c0_i32_0 = arith.constant 0 : i32
    return %arg0, %arg1, %c0_i32 : i32, i32, i32
  }
  func.func @transform_1(%arg0: i32, %arg1: i32) -> (i32, i32, i32) {
    %c0_i32 = arith.constant 0 : i32
    %c0_i32_0 = arith.constant 0 : i32
    return %arg0, %arg1, %c0_i32 : i32, i32, i32
  }
  func.func @transform_2(%arg0: i32, %arg1: i32) -> (i32, i32, i32) {
    %c0_i32 = arith.constant 0 : i32
    %c0_i32_0 = arith.constant 0 : i32
    return %arg0, %arg1, %c0_i32 : i32, i32, i32
  }
}

</mosaic_0001>

<bundles_post_ra>
// kernel: segmentation_loss.1
= control target key start
LH: loop header
LB: loop body
LE: loop exit
PB: predicated region body
PF: predicated region fallthrough
CT: control target
= control target key end

     0   :  { %7 = vsyncpa [#allocation3], 0  ;;  %s570_s0 = inlined_call_operand.hbm [shape: f32[1,128,16], index: 0, kind: input, shape index: {}]   ;;  %s571_s1 = inlined_call_operand.hbm [shape: f32[1,128,16], index: 1, kind: input, shape index: {}]   ;;  %s572_s2 = inlined_call_operand.vmem [shape: f32[1,8,16], index: 2, kind: output, shape index: {}]  }
   0x1   :  { %s13_s11 = sshll.u32 %s570_s0, 4  ;;  %s14_s11 = int_to_ptr.hbm [resolvable:$true] %s13_s11 }
   0x2   :  { %8 = vsyncpa [#allocation5], 0  ;;  %s395_s12 = smov [#allocation2]   ;;  %s26_s16 = sshll.u32 %s571_s1, 4  ;;  %s27_s16 = int_to_ptr.hbm [resolvable:$true] %s26_s16 }
   0x3   :  { %s15_s13 = sshll.u32 %s395_s12, 4  ;;  %s396_s17 = smov 128   ;;  %s16_s13 = int_to_ptr.vmem [resolvable:$true] %s15_s13 }
   0x4   :  { %s397_s18 = smov 8   ;;  %s398_s19 = smov [#allocation4]  }
   0x5   :  { %21 = dma.hbm_to_vmem [thread:$0]  %s14_s11, 2048, %s16_s13, [#allocation3], %s396_s17, %s396_s17, %s397_s18  }
   0x6   :  { %s28_s20 = sshll.u32 %s398_s19, 4  ;;  %s29_s20 = int_to_ptr.vmem [resolvable:$true] %s28_s20 }
   0x7   :  { %34 = dma.hbm_to_vmem [thread:$0]  %s27_s16, 2048, %s29_s20, [#allocation5], %s396_s17, %s396_s17, %s397_s18  }
   0x8   :  { %391 = dma.done.wait [#allocation3], 2048  }
   0x9   :  { %392 = vsyncadd [#allocation3], 4294965248 }
   0xa   :  { %393 = dma.done.wait [#allocation5], 2048  }
   0xb   :  { %394 = vsyncadd [#allocation5], 4294965248  ;;  %v43_v0 = vld [vmem:[#allocation2] sm:$0xff]  ;;  %v44_v1 = vld [vmem:[#allocation2 + $0x8] sm:$0xff]  ;;  %vm235_vm0 = vcmask 130048  }
   0xc   :  { %279 = vlog2.f32 %v43_v0  ;;  %v45_v2 = vld [vmem:[#allocation2 + $0x10] sm:$0xff]  ;;  %v46_v3 = vld [vmem:[#allocation2 + $0x18] sm:$0xff]  ;;  %v47_v4 = vld [vmem:[#allocation2 + $0x20] sm:$0xff]  ;;  %v123_v7 = vsub.f32 1.0, %v43_v0  ;;  %v124_v10 = vsub.f32 1.0, %v44_v1 }
   0xd   :  { %281 = vlog2.f32 %v44_v1  ;;  %v48_v5 = vld [vmem:[#allocation2 + $0x28] sm:$0xff]  ;;  %v49_v6 = vld [vmem:[#allocation2 + $0x30] sm:$0xff]  ;;  %v420_v9 = vld [vmem:[#allocation2 + $0x38] sm:$0xff]  ;;  %v125_v13 = vsub.f32 1.0, %v45_v2  ;;  %v126_v16 = vsub.f32 1.0, %v46_v3  ;;  %v127_v20 = vsub.f32 1.0, %v47_v4 }
   0xe   :  { %283 = vlog2.f32 %v45_v2  ;;  %v422_v12 = vld [vmem:[#allocation2 + $0x40] sm:$0xff]  ;;  %v426_v19 = vld [vmem:[#allocation2 + $0x48] sm:$0xff]  ;;  %v429_v23 = vld [vmem:[#allocation2 + $0x50] sm:$0xff]  ;;  %v128_v24 = vsub.f32 1.0, %v48_v5  ;;  %v129_v29 = vsub.f32 1.0, %v49_v6  ;;  %v130_v33 = vsub.f32 1.0, %v420_v9 }
   0xf   :  { %285 = vlog2.f32 %v46_v3  ;;  %v432_v27 = vld [vmem:[#allocation2 + $0x58] sm:$0xff]  ;;  %v434_v28 = vld [vmem:[#allocation2 + $0x60] sm:$0xff]  ;;  %v436_v31 = vld [vmem:[#allocation2 + $0x68] sm:$0xff]  ;;  %v131_v34 = vsub.f32 1.0, %v422_v12  ;;  %v132_v35 = vsub.f32 1.0, %v426_v19  ;;  %v133_v40 = vsub.f32 1.0, %v429_v23 }
  0x10   :  { %287 = vlog2.f32 %v47_v4  ;;  %v438_v32 = vld [vmem:[#allocation2 + $0x70] sm:$0xff]  ;;  %v444_v37 = vld [vmem:[#allocation2 + $0x78] sm:$0xff]  ;;  %v134_v43 = vsub.f32 1.0, %v432_v27  ;;  %v135_v44 = vsub.f32 1.0, %v434_v28  ;;  %v136_v46 = vsub.f32 1.0, %v436_v31 }
  0x11   :  { %289 = vlog2.f32 %v48_v5  ;;  %v137_v47 = vsub.f32 1.0, %v438_v32  ;;  %v138_v50 = vsub.f32 1.0, %v444_v37 }
  0x12   :  { %v280_v8 = vpop.eup %279  ;;  %291 = vlog2.f32 %v49_v6 }
  0x13   :  { %v282_v11 = vpop.eup %281  ;;  %293 = vlog2.f32 %v420_v9  ;;  %v76_v38 = vmul.f32 0.6931472, %v280_v8 }
  0x14   :  { %v284_v14 = vpop.eup %283  ;;  %295 = vlog2.f32 %v422_v12  ;;  %v78_v39 = vmul.f32 0.6931472, %v282_v11 }
  0x15   :  { %v286_v15 = vpop.eup %285  ;;  %297 = vlog2.f32 %v123_v7  ;;  %v80_v42 = vmul.f32 0.6931472, %v284_v14  ;;  %v107_v55 = vmax.f32 %v76_v38, -100.0  ;;  %v62_v38 = vld [vmem:[#allocation4 + $0x18] sm:$0xff] }
  0x16   :  { %v288_v17 = vpop.eup %287  ;;  %299 = vlog2.f32 %v124_v10  ;;  %v82_v54 = vmul.f32 0.6931472, %v286_v15  ;;  %v108_v56 = vmax.f32 %v78_v39, -100.0 }
  0x17   :  { %v290_v18 = vpop.eup %289  ;;  %301 = vlog2.f32 %v125_v13  ;;  %v84_v58 = vmul.f32 0.6931472, %v288_v17  ;;  %v109_v59 = vmax.f32 %v80_v42, -100.0 }
  0x18   :  { %v292_v21 = vpop.eup %291  ;;  %303 = vlog2.f32 %v426_v19  ;;  %v462_v62 = vmul.f32 0.6931472, %v290_v18  ;;  %v110_v8 = vmax.f32 %v82_v54, -100.0  ;;  %v59_v18 = vld [vmem:[#allocation4] sm:$0xff]  ;;  %v60_v19 = vld [vmem:[#allocation4 + $0x8] sm:$0xff] }
  0x19   :  { %v294_v22 = vpop.eup %293  ;;  %305 = vlog2.f32 %v126_v16  ;;  %v464_v63 = vmul.f32 0.6931472, %v292_v21  ;;  %v111_v10 = vmax.f32 %v84_v58, -100.0  ;;  %v63_v54 = vld [vmem:[#allocation4 + $0x20] sm:$0xff] }
  0x1a   :  { %v296_v25 = vpop.eup %295  ;;  %307 = vlog2.f32 %v429_v23  ;;  %v473_v6 = vmul.f32 0.6931472, %v294_v22  ;;  %v112_v14 = vmax.f32 %v462_v62, -100.0 }
  0x1b   :  { %v298_v26 = vpop.eup %297  ;;  %309 = vlog2.f32 %v127_v20  ;;  %v475_v7 = vmul.f32 0.6931472, %v296_v25  ;;  %v113_v15 = vmax.f32 %v464_v63, -100.0  ;;  %v61_v20 = vld [vmem:[#allocation4 + $0x10] sm:$0xff] }
  0x1c   :  { %v300_v30 = vpop.eup %299  ;;  %311 = vlog2.f32 %v432_v27  ;;  %v452_v48 = vmul.f32 0.6931472, %v298_v26 }
  0x1d   :  { %v302_v36 = vpop.eup %301  ;;  %313 = vlog2.f32 %v128_v24  ;;  %v456_v51 = vmul.f32 0.6931472, %v300_v30 }
  0x1e   :  { %v304_v41 = vpop.eup %303  ;;  %315 = vlog2.f32 %v434_v28  ;;  %v458_v52 = vmul.f32 0.6931472, %v302_v36  ;;  %v171_v0 = vmax.f32 %v452_v48, -100.0  ;;  %v114_v28 = vmax.f32 %v473_v6, -100.0 }
  0x1f   :  { %v306_v45 = vpop.eup %305  ;;  %317 = vlog2.f32 %v129_v29  ;;  %v172_v3 = vmax.f32 %v456_v51, -100.0  ;;  %v491_v26 = vmul.f32 0.6931472, %v304_v41  ;;  %v115_v29 = vmax.f32 %v475_v7, -100.0 }
  0x20   :  { %v308_v49 = vpop.eup %307  ;;  %319 = vlog2.f32 %v436_v31  ;;  %v460_v60 = vmul.f32 0.6931472, %v306_v45  ;;  %v173_v4 = vmax.f32 %v458_v52, -100.0  ;;  %v187_v16 = vsub.f32 %v107_v55, %v171_v0 }
  0x21   :  { %v310_v53 = vpop.eup %309  ;;  %321 = vlog2.f32 %v130_v33  ;;  %v188_v23 = vsub.f32 %v108_v56, %v172_v3  ;;  %v493_v27 = vmul.f32 0.6931472, %v308_v49 }
  0x22   :  { %v312_v57 = vpop.eup %311  ;;  %323 = vlog2.f32 %v131_v34  ;;  %v469_v2 = vmul.f32 0.6931472, %v310_v53  ;;  %v174_v12 = vmax.f32 %v460_v60, -100.0  ;;  %v189_v24 = vsub.f32 %v109_v59, %v173_v4 }
  0x23   :  { %v314_v61 = vpop.eup %313  ;;  %325 = vlog2.f32 %v438_v32  ;;  %v504_v39 = vmul.f32 0.6931472, %v312_v57  ;;  %v203_v41 = vmul.f32 %v187_v16, %v59_v18  ;;  %v116_v57 = vmax.f32 %v491_v26, -100.0  ;;  %v65_v32 = vld [vmem:[#allocation4 + $0x30] sm:$0xff] }
  0x24   :  { %v316_v1 = vpop.eup %315  ;;  %327 = vlog2.f32 %v444_v37  ;;  %v477_v11 = vmul.f32 0.6931472, %v314_v61  ;;  %v175_v22 = vmax.f32 %v469_v2, -100.0  ;;  %v205_v49 = vmul.f32 %v189_v24, %v61_v20  ;;  %v64_v61 = vld [vmem:[#allocation4 + $0x28] sm:$0xff] }
  0x25   :  { %v318_v5 = vpop.eup %317  ;;  %329 = vlog2.f32 %v132_v35  ;;  %v190_v35 = vsub.f32 %v110_v8, %v174_v12  ;;  %v511_v55 = vmul.f32 0.6931472, %v316_v1  ;;  %v219_v1 = vadd.f32 %v203_v41, %v171_v0 }
  0x26   :  { %v320_v9 = vpop.eup %319  ;;  %331 = vlog2.f32 %v133_v40  ;;  %v484_v21 = vmul.f32 0.6931472, %v318_v5  ;;  %v176_v34 = vmax.f32 %v477_v11, -100.0  ;;  %v191_v45 = vsub.f32 %v111_v10, %v175_v22 }
  0x27   :  { %v322_v13 = vpop.eup %321  ;;  %333 = vlog2.f32 %v134_v43  ;;  %v513_v56 = vmul.f32 0.6931472, %v320_v9  ;;  %v206_v59 = vmul.f32 %v190_v35, %v62_v38  ;;  %v221_v7 = vadd.f32 %v205_v49, %v173_v4 }
  0x28   :  { %v324_v17 = vpop.eup %323  ;;  %v499_v33 = vmul.f32 0.6931472, %v322_v13  ;;  %335 = vlog2.f32 %v135_v44  ;;  %v177_v43 = vmax.f32 %v484_v21, -100.0  ;;  %v204_v44 = vmul.f32 %v188_v23, %v60_v19  ;;  %v66_v13 = vld [vmem:[#allocation4 + $0x38] sm:$0xff]  ;;  %v67_v21 = vld [vmem:[#allocation4 + $0x40] sm:$0xff] }
  0x29   :  { %v326_v25 = vpop.eup %325  ;;  %v506_v40 = vmul.f32 0.6931472, %v324_v17  ;;  %337 = vlog2.f32 %v136_v46  ;;  %v192_v58 = vsub.f32 %v112_v14, %v176_v34  ;;  %v207_v5 = vmul.f32 %v191_v45, %v63_v54 }
  0x2a   :  { %v497_v30 = vpop.eup %327  ;;  %339 = vlog2.f32 %v137_v47  ;;  %v178_v46 = vmax.f32 %v499_v33, -100.0  ;;  %v193_v47 = vsub.f32 %v113_v15, %v177_v43  ;;  %v220_v6 = vadd.f32 %v204_v44, %v172_v3 }
  0x2b   :  { %v330_v36 = vpop.eup %329  ;;  %341 = vlog2.f32 %v138_v50  ;;  %v179_v63 = vmax.f32 %v506_v40, -100.0  ;;  %v532_v9 = vmul.f32 0.6931472, %v326_v25  ;;  %v117_v37 = vmax.f32 %v493_v27, -100.0 }
  0x2c   :  { %v332_v42 = vpop.eup %331  ;;  %v518_v31 = vmul.f32 0.6931472, %v330_v36  ;;  %v118_v50 = vmax.f32 %v504_v39, -100.0  ;;  %v194_v0 = vsub.f32 %v114_v28, %v178_v46  ;;  %v208_v11 = vmul.f32 %v192_v58, %v64_v61 }
  0x2d   :  { %v334_v53 = vpop.eup %333  ;;  %v521_v62 = vmul.f32 0.6931472, %v332_v42  ;;  %v222_v51 = vadd.f32 %v206_v59, %v174_v12  ;;  %v195_v14 = vsub.f32 %v115_v29, %v179_v63  ;;  %v236_v15 = vsel %vm235_vm0, %v219_v1, 0.0  ;;  %v68_v29 = vld [vmem:[#allocation4 + $0x48] sm:$0xff]  ;;  %v69_v42 = vld [vmem:[#allocation4 + $0x50] sm:$0xff] }
  0x2e   :  { %v336_v2 = vpop.eup %335  ;;  %v536_v10 = vmul.f32 0.6931472, %v334_v53  ;;  %v180_v48 = vmax.f32 %v518_v31, -100.0  ;;  %v209_v16 = vmul.f32 %v193_v47, %v65_v32  ;;  %v223_v17 = vadd.f32 %v207_v5, %v175_v22 }
  0x2f   :  { %v338_v8 = vpop.eup %337  ;;  %v541_v52 = vmul.f32 0.6931472, %v336_v2  ;;  %v181_v4 = vmax.f32 %v521_v62, -100.0  ;;  %v237_v18 = vsel %vm235_vm0, %v220_v6, 0.0  ;;  %v239_v19 = vsel %vm235_vm0, %v221_v7, 0.0  ;;  %v71_v2 = vld [vmem:[#allocation4 + $0x60] sm:$0xff] }
  0x30   :  { %v340_v3 = vpop.eup %339  ;;  %v119_v60 = vmax.f32 %v511_v55, -100.0  ;;  %v166_v12 = vmul.f32 0.6931472, %v338_v8  ;;  %v182_v23 = vmax.f32 %v536_v10, -100.0  ;;  %v238_v24 = vadd.f32 %v237_v18, %v236_v15  ;;  %v72_v8 = vld [vmem:[#allocation4 + $0x68] sm:$0xff] }
  0x31   :  { %v342_v20 = vpop.eup %341  ;;  %v196_v25 = vsub.f32 %v116_v57, %v180_v48  ;;  %v210_v26 = vmul.f32 %v194_v0, %v66_v13  ;;  %v224_v27 = vadd.f32 %v208_v11, %v176_v34  ;;  %v241_v28 = vsel %vm235_vm0, %v222_v51, 0.0  ;;  %v70_v57 = vld [vmem:[#allocation4 + $0x58] sm:$0xff]  ;;  %v73_v11 = vld [vmem:[#allocation4 + $0x70] sm:$0xff] }
  0x32   :  { %v106_v22 = vmul.f32 0.6931472, %v497_v30  ;;  %v168_v33 = vmul.f32 0.6931472, %v340_v3  ;;  %v183_v35 = vmax.f32 %v541_v52, -100.0  ;;  %v240_v36 = vadd.f32 %v239_v19, %v238_v24 }
  0x33   :  { %v197_v38 = vsub.f32 %v117_v37, %v181_v4  ;;  %v211_v39 = vmul.f32 %v195_v14, %v67_v21  ;;  %v225_v40 = vadd.f32 %v209_v16, %v177_v43  ;;  %v243_v41 = vsel %vm235_vm0, %v223_v17, 0.0  ;;  %v74_v14 = vld [vmem:[#allocation4 + $0x78] sm:$0xff] }
  0x34   :  { %v120_v45 = vmax.f32 %v513_v56, -100.0  ;;  %v170_v44 = vmul.f32 0.6931472, %v342_v20  ;;  %v184_v49 = vmax.f32 %v166_v12, -100.0  ;;  %v242_v34 = vadd.f32 %v241_v28, %v240_v36 }
  0x35   :  { %v198_v53 = vsub.f32 %v118_v50, %v182_v23  ;;  %v212_v54 = vmul.f32 %v196_v25, %v68_v29  ;;  %v226_v55 = vadd.f32 %v210_v26, %v178_v46  ;;  %v245_v30 = vsel %vm235_vm0, %v224_v27, 0.0 }
  0x36   :  { %v121_v31 = vmax.f32 %v532_v9, -100.0  ;;  %v185_v58 = vmax.f32 %v168_v33, -100.0  ;;  %v244_v59 = vadd.f32 %v243_v41, %v242_v34  ;;  %v199_v61 = vsub.f32 %v119_v60, %v183_v35 }
  0x37   :  { %v213_v43 = vmul.f32 %v197_v38, %v69_v42  ;;  %v227_v62 = vadd.f32 %v211_v39, %v179_v63  ;;  %v247_v1 = vsel %vm235_vm0, %v225_v40, 0.0  ;;  %v122_v56 = vmax.f32 %v106_v22, -100.0 }
  0x38   :  { %v186_v32 = vmax.f32 %v170_v44, -100.0  ;;  %v246_v47 = vadd.f32 %v245_v30, %v244_v59  ;;  %v200_v5 = vsub.f32 %v120_v45, %v184_v49  ;;  %v214_v6 = vmul.f32 %v198_v53, %v70_v57 }
  0x39   :  { %v228_v7 = vadd.f32 %v212_v54, %v180_v48  ;;  %v249_v46 = vsel %vm235_vm0, %v226_v55, 0.0  ;;  %v201_v50 = vsub.f32 %v121_v31, %v185_v58  ;;  %v215_v9 = vmul.f32 %v199_v61, %v71_v2 }
  0x3a   :  { %v248_v37 = vadd.f32 %v247_v1, %v246_v47  ;;  %v229_v10 = vadd.f32 %v213_v43, %v181_v4  ;;  %v251_v0 = vsel %vm235_vm0, %v227_v62, 0.0  ;;  %v202_v51 = vsub.f32 %v122_v56, %v186_v32 }
  0x3b   :  { %v216_v3 = vmul.f32 %v200_v5, %v72_v8  ;;  %v230_v13 = vadd.f32 %v214_v6, %v182_v23  ;;  %v253_v52 = vsel %vm235_vm0, %v228_v7, 0.0  ;;  %v217_v16 = vmul.f32 %v201_v50, %v73_v11 }
  0x3c   :  { %v250_v63 = vadd.f32 %v249_v46, %v248_v37  ;;  %v231_v48 = vadd.f32 %v215_v9, %v183_v35  ;;  %v255_v17 = vsel %vm235_vm0, %v229_v10, 0.0  ;;  %v218_v19 = vmul.f32 %v202_v51, %v74_v14 }
  0x3d   :  { %v232_v20 = vadd.f32 %v216_v3, %v184_v49  ;;  %v257_v4 = vsel %vm235_vm0, %v230_v13, 0.0  ;;  %v233_v60 = vadd.f32 %v217_v16, %v185_v58 }
  0x3e   :  { %v252_v15 = vadd.f32 %v251_v0, %v250_v63  ;;  %v259_v12 = vsel %vm235_vm0, %v231_v48, 0.0  ;;  %v234_v25 = vadd.f32 %v218_v19, %v186_v32 }
  0x3f   :  { %v261_v23 = vsel %vm235_vm0, %v232_v20, 0.0  ;;  %v263_v27 = vsel %vm235_vm0, %v233_v60, 0.0 }
  0x40   :  { %v254_v18 = vadd.f32 %v253_v52, %v252_v15  ;;  %v265_v29 = vsel %vm235_vm0, %v234_v25, 0.0 }
  0x42   :  { %v256_v21 = vadd.f32 %v255_v17, %v254_v18 }
  0x44   :  { %v258_v24 = vadd.f32 %v257_v4, %v256_v21 }
  0x46   :  { %v260_v26 = vadd.f32 %v259_v12, %v258_v24 }
  0x48   :  { %v262_v28 = vadd.f32 %v261_v23, %v260_v26 }
  0x4a   :  { %v264_v22 = vadd.f32 %v263_v27, %v262_v28 }
  0x4c   :  { %v266_v33 = vadd.f32 %v265_v29, %v264_v22 }
  0x4e   :  { %268 = vst.msk [vmem:[%s572_s2] sm:$0xff] %vm235_vm0, %v266_v33 }
  0x4f   :  { %273 = vsyncpa [#allocation3], 1 }
  0x50   :  { %274 = vsyncpa [#allocation5], 1 }

</bundles_post_ra>
